<compile_context>
chip_gen: v6e
topology: v6e:2x2x1
jax: 0.10.0
libtpu: 0.0.40
codegen_flags: <defaults>
</compile_context>

<pallas_src>
import jax
import jax.numpy as jnp
import numpy as np
from jax.experimental import pallas as pl
from jax.experimental.pallas import tpu as pltpu

# ---- "config" (small, synthetic) -------------------------------------------
VOCAB_SIZE = 64
HIDDEN = 32        # TODO(synk): real RoBERTa H=768 (multiple of 128) makes the
                   # output stores fully lane-dense; at H=32 stores are masked.
MAX_POS = 24
TYPE_VOCAB = 2
PAD_ID = 1         # config.pad_token_id (RoBERTa convention)
LN_EPS = 1e-5
PAST_KV_LEN = 0    # past_key_values_length
TILE = 8           # tokens per grid step (multiple of 8 sublanes)
# TODO(synk): dropout (config.hidden_dropout_prob) is identity here (eval mode).


def roberta_embeddings_kernel(ids_ref, pos_ref,            # scalar prefetch (SMEM)
                              wtab_hbm, ptab_hbm,          # HBM tables (pl.ANY)
                              trow_ref, gamma_ref, beta_ref,  # (1, H) resident VMEM
                              out_ref,                     # (TILE, H) VMEM
                              wrows, prows, sem):          # scratch
    tile = pl.program_id(0)
    base = tile * TILE
    H = out_ref.shape[1]

    # Issue all 2*TILE row-gather DMAs up front so they are in flight
    # concurrently, then wait and compute vectorized over the whole tile.
    copies = []
    for t in range(TILE):
        wid = ids_ref[base + t]          # word row index (dynamic, from SMEM)
        pid = pos_ref[base + t]          # position row index
        cw = pltpu.make_async_copy(wtab_hbm.at[pl.ds(wid, 1), :],
                                   wrows.at[pl.ds(t, 1), :], sem.at[0, t])
        cp = pltpu.make_async_copy(ptab_hbm.at[pl.ds(pid, 1), :],
                                   prows.at[pl.ds(t, 1), :], sem.at[1, t])
        cw.start()
        cp.start()
        copies.append(cw)
        copies.append(cp)
    for c in copies:
        c.wait()

    # word + position + (constant, all-zero token_type_ids) type embedding
    emb = wrows[...] + prows[...] + trow_ref[...]            # (TILE, H)

    # One-pass LayerNorm statistics: sum and sum of squares in a single sweep.
    s = jnp.sum(emb, axis=-1, keepdims=True)
    s2 = jnp.sum(emb * emb, axis=-1, keepdims=True)
    inv_h = 1.0 / H
    mean = s * inv_h
    var = s2 * inv_h - mean * mean
    inv = jax.lax.rsqrt(var + LN_EPS)
    out_ref[...] = (emb - mean) * inv * gamma_ref[...] + beta_ref[...]


def roberta_embeddings(input_ids, word_tab, pos_tab, type_tab, gamma, beta):
    B, S = input_ids.shape
    H = word_tab.shape[1]
    N = B * S
    assert N % TILE == 0, "toy wrapper assumes B*S divisible by TILE"
    n_tiles = N // TILE

    # create_position_ids_from_input_ids -- cheap XLA cumsum outside the kernel.
    mask = (input_ids != PAD_ID).astype(jnp.int32)
    pos_ids = (jnp.cumsum(mask, axis=1) + PAST_KV_LEN) * mask + PAD_ID

    ids_flat = input_ids.reshape(N).astype(jnp.int32)
    pos_flat = pos_ids.reshape(N).astype(jnp.int32)
    type_row = type_tab[0:1, :]          # token_type_ids are all zero

    out_flat = pl.pallas_call(
        roberta_embeddings_kernel,
        out_shape=jax.ShapeDtypeStruct((N, H), jnp.float32),
        grid_spec=pltpu.PrefetchScalarGridSpec(
            num_scalar_prefetch=2,
            grid=(n_tiles,),
            in_specs=[
                pl.BlockSpec(memory_space=pl.ANY),   # word table stays in HBM
                pl.BlockSpec(memory_space=pl.ANY),   # position table stays in HBM
                pl.BlockSpec((1, H), lambda i, ids, pos: (0, 0)),  # type row
                pl.BlockSpec((1, H), lambda i, ids, pos: (0, 0)),  # gamma
                pl.BlockSpec((1, H), lambda i, ids, pos: (0, 0)),  # beta
            ],
            out_specs=pl.BlockSpec((TILE, H), lambda i, ids, pos: (i, 0)),
            scratch_shapes=[
                pltpu.VMEM((TILE, H), jnp.float32),  # gathered word rows
                pltpu.VMEM((TILE, H), jnp.float32),  # gathered position rows
                pltpu.SemaphoreType.DMA((2, TILE)),
            ],
        ),
        compiler_params=pltpu.CompilerParams(
            dimension_semantics=("parallel",),
        ),
    )(ids_flat, pos_flat, word_tab, pos_tab, type_row, gamma, beta)
    return out_flat.reshape(B, S, H)


def reference(input_ids, word_tab, pos_tab, type_tab, gamma, beta):
    mask = (input_ids != PAD_ID).astype(jnp.int32)
    pos_ids = (jnp.cumsum(mask, axis=1) + PAST_KV_LEN) * mask + PAD_ID
    we = word_tab[input_ids]
    pe = pos_tab[pos_ids]
    te = type_tab[jnp.zeros_like(input_ids)]
    emb = we + te + pe
    mean = emb.mean(-1, keepdims=True)
    var = ((emb - mean) ** 2).mean(-1, keepdims=True)
    return (emb - mean) * jax.lax.rsqrt(var + LN_EPS) * gamma + beta


if __name__ == "__main__":
    key = jax.random.PRNGKey(0)
    k_w, k_p, k_t, k_g, k_b, k_ids = jax.random.split(key, 6)

    # Deterministic parameter init (shapes per nn.Embedding / nn.LayerNorm).
    word_tab = jax.random.normal(k_w, (VOCAB_SIZE, HIDDEN), jnp.float32) * 0.02
    word_tab = word_tab.at[PAD_ID].set(0.0)       # padding_idx row zeroed
    pos_tab = jax.random.normal(k_p, (MAX_POS, HIDDEN), jnp.float32) * 0.02
    pos_tab = pos_tab.at[PAD_ID].set(0.0)         # padding_idx row zeroed
    type_tab = jax.random.normal(k_t, (TYPE_VOCAB, HIDDEN), jnp.float32) * 0.02
    gamma = 1.0 + 0.1 * jax.random.normal(k_g, (1, HIDDEN), jnp.float32)
    beta = 0.1 * jax.random.normal(k_b, (1, HIDDEN), jnp.float32)

    # Inputs: batch=2, seq=8, with trailing padding tokens in row 1.
    B, S = 2, 8
    ids = jax.random.randint(k_ids, (B, S), 2, VOCAB_SIZE, jnp.int32)
    ids = ids.at[1, 5:].set(PAD_ID)

    out = roberta_embeddings(ids, word_tab, pos_tab, type_tab, gamma, beta)
    out = jax.block_until_ready(out)

    ref = reference(ids, word_tab, pos_tab, type_tab, gamma, beta)
    np.testing.assert_allclose(np.asarray(out), np.asarray(ref),
                               rtol=1e-5, atol=1e-5)
    print("KERNEL_OK")
</pallas_src>

<mosaic_0001>
module attributes {stable_mosaic.version = 11 : i64} {
  func.func @roberta_embeddings_kernel(%arg0: i32, %arg1: memref<16xi32, #tpu.memory_space<smem>>, %arg2: memref<16xi32, #tpu.memory_space<smem>>, %arg3: memref<64x32xf32, #tpu.memory_space<any>>, %arg4: memref<24x32xf32, #tpu.memory_space<any>>, %arg5: memref<1x32xf32, #tpu.memory_space<vmem>>, %arg6: memref<1x32xf32, #tpu.memory_space<vmem>>, %arg7: memref<1x32xf32, #tpu.memory_space<vmem>>, %arg8: memref<8x32xf32, #tpu.memory_space<vmem>>, %arg9: memref<8x32xf32, #tpu.memory_space<vmem>>, %arg10: memref<8x32xf32, #tpu.memory_space<vmem>>, %arg11: memref<2x8x!tpu.dma_semaphore, #tpu.memory_space<semaphore_mem>>) attributes {dimension_semantics = [#tpu.dimension_semantics<parallel>], iteration_bounds = array<i64: 2>, scalar_prefetch = 2 : i64, scratch_operands = 3 : i64, tpu.core_type = #tpu.core_type<tc>, window_params = [{}, {}, {pipeline_mode = #tpu.pipeline_mode<synchronous>, transform_indices = @transform_2, window_bounds = array<i64: 1, 32>}, {pipeline_mode = #tpu.pipeline_mode<synchronous>, transform_indices = @transform_3, window_bounds = array<i64: 1, 32>}, {pipeline_mode = #tpu.pipeline_mode<synchronous>, transform_indices = @transform_4, window_bounds = array<i64: 1, 32>}, {transform_indices = @transform_5, window_bounds = array<i64: 8, 32>}]} {
    %c8_i32 = arith.constant 8 : i32
    %0 = arith.muli %arg0, %c8_i32 : i32
    %c0_i32 = arith.constant 0 : i32
    %1 = arith.addi %0, %c0_i32 : i32
    %2 = arith.index_cast %1 : i32 to index
    %3 = memref.load %arg1[%2] : memref<16xi32, #tpu.memory_space<smem>>
    %c0_i32_0 = arith.constant 0 : i32
    %4 = arith.addi %0, %c0_i32_0 : i32
    %5 = arith.index_cast %4 : i32 to index
    %6 = memref.load %arg2[%5] : memref<16xi32, #tpu.memory_space<smem>>
    %c0_i32_1 = arith.constant 0 : i32
    %c0_i32_2 = arith.constant 0 : i32
    %c0_i32_3 = arith.constant 0 : i32
    %7 = tpu.memref_slice %arg3[%3, %c0_i32_3] : memref<64x32xf32, #tpu.memory_space<any>> -> memref<1x32xf32, #tpu.memory_space<any>>
    %c0_i32_4 = arith.constant 0 : i32
    %c0_i32_5 = arith.constant 0 : i32
    %8 = tpu.memref_slice %arg9[%c0_i32_4, %c0_i32_5] : memref<8x32xf32, #tpu.memory_space<vmem>> -> memref<1x32xf32, #tpu.memory_space<vmem>>
    %9 = tpu.memref_slice %arg11[%c0_i32_1, %c0_i32_2] : memref<2x8x!tpu.dma_semaphore, #tpu.memory_space<semaphore_mem>> -> memref<1x1x!tpu.dma_semaphore, #tpu.memory_space<semaphore_mem>>
    %10 = tpu.memref_squeeze %9 : memref<1x1x!tpu.dma_semaphore, #tpu.memory_space<semaphore_mem>> -> memref<!tpu.dma_semaphore, #tpu.memory_space<semaphore_mem>>
    tpu.enqueue_dma source(%7 : memref<1x32xf32, #tpu.memory_space<any>>) target(%8 : memref<1x32xf32, #tpu.memory_space<vmem>>) target_semaphore(%10 : memref<!tpu.dma_semaphore, #tpu.memory_space<semaphore_mem>>)
    %c1_i32 = arith.constant 1 : i32
    %c0_i32_6 = arith.constant 0 : i32
    %c0_i32_7 = arith.constant 0 : i32
    %11 = tpu.memref_slice %arg4[%6, %c0_i32_7] : memref<24x32xf32, #tpu.memory_space<any>> -> memref<1x32xf32, #tpu.memory_space<any>>
    %c0_i32_8 = arith.constant 0 : i32
    %c0_i32_9 = arith.constant 0 : i32
    %12 = tpu.memref_slice %arg10[%c0_i32_8, %c0_i32_9] : memref<8x32xf32, #tpu.memory_space<vmem>> -> memref<1x32xf32, #tpu.memory_space<vmem>>
    %13 = tpu.memref_slice %arg11[%c1_i32, %c0_i32_6] : memref<2x8x!tpu.dma_semaphore, #tpu.memory_space<semaphore_mem>> -> memref<1x1x!tpu.dma_semaphore, #tpu.memory_space<semaphore_mem>>
    %14 = tpu.memref_squeeze %13 : memref<1x1x!tpu.dma_semaphore, #tpu.memory_space<semaphore_mem>> -> memref<!tpu.dma_semaphore, #tpu.memory_space<semaphore_mem>>
    tpu.enqueue_dma source(%11 : memref<1x32xf32, #tpu.memory_space<any>>) target(%12 : memref<1x32xf32, #tpu.memory_space<vmem>>) target_semaphore(%14 : memref<!tpu.dma_semaphore, #tpu.memory_space<semaphore_mem>>)
    %c1_i32_10 = arith.constant 1 : i32
    %15 = arith.addi %0, %c1_i32_10 : i32
    %16 = arith.index_cast %15 : i32 to index
    %17 = memref.load %arg1[%16] : memref<16xi32, #tpu.memory_space<smem>>
    %c1_i32_11 = arith.constant 1 : i32
    %18 = arith.addi %0, %c1_i32_11 : i32
    %19 = arith.index_cast %18 : i32 to index
    %20 = memref.load %arg2[%19] : memref<16xi32, #tpu.memory_space<smem>>
    %c0_i32_12 = arith.constant 0 : i32
    %c1_i32_13 = arith.constant 1 : i32
    %c0_i32_14 = arith.constant 0 : i32
    %21 = tpu.memref_slice %arg3[%17, %c0_i32_14] : memref<64x32xf32, #tpu.memory_space<any>> -> memref<1x32xf32, #tpu.memory_space<any>>
    %c1_i32_15 = arith.constant 1 : i32
    %c0_i32_16 = arith.constant 0 : i32
    %22 = tpu.memref_slice %arg9[%c1_i32_15, %c0_i32_16] : memref<8x32xf32, #tpu.memory_space<vmem>> -> memref<1x32xf32, #tpu.memory_space<vmem>>
    %23 = tpu.memref_slice %arg11[%c0_i32_12, %c1_i32_13] : memref<2x8x!tpu.dma_semaphore, #tpu.memory_space<semaphore_mem>> -> memref<1x1x!tpu.dma_semaphore, #tpu.memory_space<semaphore_mem>>
    %24 = tpu.memref_squeeze %23 : memref<1x1x!tpu.dma_semaphore, #tpu.memory_space<semaphore_mem>> -> memref<!tpu.dma_semaphore, #tpu.memory_space<semaphore_mem>>
    tpu.enqueue_dma source(%21 : memref<1x32xf32, #tpu.memory_space<any>>) target(%22 : memref<1x32xf32, #tpu.memory_space<vmem>>) target_semaphore(%24 : memref<!tpu.dma_semaphore, #tpu.memory_space<semaphore_mem>>)
    %c1_i32_17 = arith.constant 1 : i32
    %c1_i32_18 = arith.constant 1 : i32
    %c0_i32_19 = arith.constant 0 : i32
    %25 = tpu.memref_slice %arg4[%20, %c0_i32_19] : memref<24x32xf32, #tpu.memory_space<any>> -> memref<1x32xf32, #tpu.memory_space<any>>
    %c1_i32_20 = arith.constant 1 : i32
    %c0_i32_21 = arith.constant 0 : i32
    %26 = tpu.memref_slice %arg10[%c1_i32_20, %c0_i32_21] : memref<8x32xf32, #tpu.memory_space<vmem>> -> memref<1x32xf32, #tpu.memory_space<vmem>>
    %27 = tpu.memref_slice %arg11[%c1_i32_17, %c1_i32_18] : memref<2x8x!tpu.dma_semaphore, #tpu.memory_space<semaphore_mem>> -> memref<1x1x!tpu.dma_semaphore, #tpu.memory_space<semaphore_mem>>
    %28 = tpu.memref_squeeze %27 : memref<1x1x!tpu.dma_semaphore, #tpu.memory_space<semaphore_mem>> -> memref<!tpu.dma_semaphore, #tpu.memory_space<semaphore_mem>>
    tpu.enqueue_dma source(%25 : memref<1x32xf32, #tpu.memory_space<any>>) target(%26 : memref<1x32xf32, #tpu.memory_space<vmem>>) target_semaphore(%28 : memref<!tpu.dma_semaphore, #tpu.memory_space<semaphore_mem>>)
    %c2_i32 = arith.constant 2 : i32
    %29 = arith.addi %0, %c2_i32 : i32
    %30 = arith.index_cast %29 : i32 to index
    %31 = memref.load %arg1[%30] : memref<16xi32, #tpu.memory_space<smem>>
    %c2_i32_22 = arith.constant 2 : i32
    %32 = arith.addi %0, %c2_i32_22 : i32
    %33 = arith.index_cast %32 : i32 to index
    %34 = memref.load %arg2[%33] : memref<16xi32, #tpu.memory_space<smem>>
    %c0_i32_23 = arith.constant 0 : i32
    %c2_i32_24 = arith.constant 2 : i32
    %c0_i32_25 = arith.constant 0 : i32
    %35 = tpu.memref_slice %arg3[%31, %c0_i32_25] : memref<64x32xf32, #tpu.memory_space<any>> -> memref<1x32xf32, #tpu.memory_space<any>>
    %c2_i32_26 = arith.constant 2 : i32
    %c0_i32_27 = arith.constant 0 : i32
    %36 = tpu.memref_slice %arg9[%c2_i32_26, %c0_i32_27] : memref<8x32xf32, #tpu.memory_space<vmem>> -> memref<1x32xf32, #tpu.memory_space<vmem>>
    %37 = tpu.memref_slice %arg11[%c0_i32_23, %c2_i32_24] : memref<2x8x!tpu.dma_semaphore, #tpu.memory_space<semaphore_mem>> -> memref<1x1x!tpu.dma_semaphore, #tpu.memory_space<semaphore_mem>>
    %38 = tpu.memref_squeeze %37 : memref<1x1x!tpu.dma_semaphore, #tpu.memory_space<semaphore_mem>> -> memref<!tpu.dma_semaphore, #tpu.memory_space<semaphore_mem>>
    tpu.enqueue_dma source(%35 : memref<1x32xf32, #tpu.memory_space<any>>) target(%36 : memref<1x32xf32, #tpu.memory_space<vmem>>) target_semaphore(%38 : memref<!tpu.dma_semaphore, #tpu.memory_space<semaphore_mem>>)
    %c1_i32_28 = arith.constant 1 : i32
    %c2_i32_29 = arith.constant 2 : i32
    %c0_i32_30 = arith.constant 0 : i32
    %39 = tpu.memref_slice %arg4[%34, %c0_i32_30] : memref<24x32xf32, #tpu.memory_space<any>> -> memref<1x32xf32, #tpu.memory_space<any>>
    %c2_i32_31 = arith.constant 2 : i32
    %c0_i32_32 = arith.constant 0 : i32
    %40 = tpu.memref_slice %arg10[%c2_i32_31, %c0_i32_32] : memref<8x32xf32, #tpu.memory_space<vmem>> -> memref<1x32xf32, #tpu.memory_space<vmem>>
    %41 = tpu.memref_slice %arg11[%c1_i32_28, %c2_i32_29] : memref<2x8x!tpu.dma_semaphore, #tpu.memory_space<semaphore_mem>> -> memref<1x1x!tpu.dma_semaphore, #tpu.memory_space<semaphore_mem>>
    %42 = tpu.memref_squeeze %41 : memref<1x1x!tpu.dma_semaphore, #tpu.memory_space<semaphore_mem>> -> memref<!tpu.dma_semaphore, #tpu.memory_space<semaphore_mem>>
    tpu.enqueue_dma source(%39 : memref<1x32xf32, #tpu.memory_space<any>>) target(%40 : memref<1x32xf32, #tpu.memory_space<vmem>>) target_semaphore(%42 : memref<!tpu.dma_semaphore, #tpu.memory_space<semaphore_mem>>)
    %c3_i32 = arith.constant 3 : i32
    %43 = arith.addi %0, %c3_i32 : i32
    %44 = arith.index_cast %43 : i32 to index
    %45 = memref.load %arg1[%44] : memref<16xi32, #tpu.memory_space<smem>>
    %c3_i32_33 = arith.constant 3 : i32
    %46 = arith.addi %0, %c3_i32_33 : i32
    %47 = arith.index_cast %46 : i32 to index
    %48 = memref.load %arg2[%47] : memref<16xi32, #tpu.memory_space<smem>>
    %c0_i32_34 = arith.constant 0 : i32
    %c3_i32_35 = arith.constant 3 : i32
    %c0_i32_36 = arith.constant 0 : i32
    %49 = tpu.memref_slice %arg3[%45, %c0_i32_36] : memref<64x32xf32, #tpu.memory_space<any>> -> memref<1x32xf32, #tpu.memory_space<any>>
    %c3_i32_37 = arith.constant 3 : i32
    %c0_i32_38 = arith.constant 0 : i32
    %50 = tpu.memref_slice %arg9[%c3_i32_37, %c0_i32_38] : memref<8x32xf32, #tpu.memory_space<vmem>> -> memref<1x32xf32, #tpu.memory_space<vmem>>
    %51 = tpu.memref_slice %arg11[%c0_i32_34, %c3_i32_35] : memref<2x8x!tpu.dma_semaphore, #tpu.memory_space<semaphore_mem>> -> memref<1x1x!tpu.dma_semaphore, #tpu.memory_space<semaphore_mem>>
    %52 = tpu.memref_squeeze %51 : memref<1x1x!tpu.dma_semaphore, #tpu.memory_space<semaphore_mem>> -> memref<!tpu.dma_semaphore, #tpu.memory_space<semaphore_mem>>
    tpu.enqueue_dma source(%49 : memref<1x32xf32, #tpu.memory_space<any>>) target(%50 : memref<1x32xf32, #tpu.memory_space<vmem>>) target_semaphore(%52 : memref<!tpu.dma_semaphore, #tpu.memory_space<semaphore_mem>>)
    %c1_i32_39 = arith.constant 1 : i32
    %c3_i32_40 = arith.constant 3 : i32
    %c0_i32_41 = arith.constant 0 : i32
    %53 = tpu.memref_slice %arg4[%48, %c0_i32_41] : memref<24x32xf32, #tpu.memory_space<any>> -> memref<1x32xf32, #tpu.memory_space<any>>
    %c3_i32_42 = arith.constant 3 : i32
    %c0_i32_43 = arith.constant 0 : i32
    %54 = tpu.memref_slice %arg10[%c3_i32_42, %c0_i32_43] : memref<8x32xf32, #tpu.memory_space<vmem>> -> memref<1x32xf32, #tpu.memory_space<vmem>>
    %55 = tpu.memref_slice %arg11[%c1_i32_39, %c3_i32_40] : memref<2x8x!tpu.dma_semaphore, #tpu.memory_space<semaphore_mem>> -> memref<1x1x!tpu.dma_semaphore, #tpu.memory_space<semaphore_mem>>
    %56 = tpu.memref_squeeze %55 : memref<1x1x!tpu.dma_semaphore, #tpu.memory_space<semaphore_mem>> -> memref<!tpu.dma_semaphore, #tpu.memory_space<semaphore_mem>>
    tpu.enqueue_dma source(%53 : memref<1x32xf32, #tpu.memory_space<any>>) target(%54 : memref<1x32xf32, #tpu.memory_space<vmem>>) target_semaphore(%56 : memref<!tpu.dma_semaphore, #tpu.memory_space<semaphore_mem>>)
    %c4_i32 = arith.constant 4 : i32
    %57 = arith.addi %0, %c4_i32 : i32
    %58 = arith.index_cast %57 : i32 to index
    %59 = memref.load %arg1[%58] : memref<16xi32, #tpu.memory_space<smem>>
    %c4_i32_44 = arith.constant 4 : i32
    %60 = arith.addi %0, %c4_i32_44 : i32
    %61 = arith.index_cast %60 : i32 to index
    %62 = memref.load %arg2[%61] : memref<16xi32, #tpu.memory_space<smem>>
    %c0_i32_45 = arith.constant 0 : i32
    %c4_i32_46 = arith.constant 4 : i32
    %c0_i32_47 = arith.constant 0 : i32
    %63 = tpu.memref_slice %arg3[%59, %c0_i32_47] : memref<64x32xf32, #tpu.memory_space<any>> -> memref<1x32xf32, #tpu.memory_space<any>>
    %c4_i32_48 = arith.constant 4 : i32
    %c0_i32_49 = arith.constant 0 : i32
    %64 = tpu.memref_slice %arg9[%c4_i32_48, %c0_i32_49] : memref<8x32xf32, #tpu.memory_space<vmem>> -> memref<1x32xf32, #tpu.memory_space<vmem>>
    %65 = tpu.memref_slice %arg11[%c0_i32_45, %c4_i32_46] : memref<2x8x!tpu.dma_semaphore, #tpu.memory_space<semaphore_mem>> -> memref<1x1x!tpu.dma_semaphore, #tpu.memory_space<semaphore_mem>>
    %66 = tpu.memref_squeeze %65 : memref<1x1x!tpu.dma_semaphore, #tpu.memory_space<semaphore_mem>> -> memref<!tpu.dma_semaphore, #tpu.memory_space<semaphore_mem>>
    tpu.enqueue_dma source(%63 : memref<1x32xf32, #tpu.memory_space<any>>) target(%64 : memref<1x32xf32, #tpu.memory_space<vmem>>) target_semaphore(%66 : memref<!tpu.dma_semaphore, #tpu.memory_space<semaphore_mem>>)
    %c1_i32_50 = arith.constant 1 : i32
    %c4_i32_51 = arith.constant 4 : i32
    %c0_i32_52 = arith.constant 0 : i32
    %67 = tpu.memref_slice %arg4[%62, %c0_i32_52] : memref<24x32xf32, #tpu.memory_space<any>> -> memref<1x32xf32, #tpu.memory_space<any>>
    %c4_i32_53 = arith.constant 4 : i32
    %c0_i32_54 = arith.constant 0 : i32
    %68 = tpu.memref_slice %arg10[%c4_i32_53, %c0_i32_54] : memref<8x32xf32, #tpu.memory_space<vmem>> -> memref<1x32xf32, #tpu.memory_space<vmem>>
    %69 = tpu.memref_slice %arg11[%c1_i32_50, %c4_i32_51] : memref<2x8x!tpu.dma_semaphore, #tpu.memory_space<semaphore_mem>> -> memref<1x1x!tpu.dma_semaphore, #tpu.memory_space<semaphore_mem>>
    %70 = tpu.memref_squeeze %69 : memref<1x1x!tpu.dma_semaphore, #tpu.memory_space<semaphore_mem>> -> memref<!tpu.dma_semaphore, #tpu.memory_space<semaphore_mem>>
    tpu.enqueue_dma source(%67 : memref<1x32xf32, #tpu.memory_space<any>>) target(%68 : memref<1x32xf32, #tpu.memory_space<vmem>>) target_semaphore(%70 : memref<!tpu.dma_semaphore, #tpu.memory_space<semaphore_mem>>)
    %c5_i32 = arith.constant 5 : i32
    %71 = arith.addi %0, %c5_i32 : i32
    %72 = arith.index_cast %71 : i32 to index
    %73 = memref.load %arg1[%72] : memref<16xi32, #tpu.memory_space<smem>>
    %c5_i32_55 = arith.constant 5 : i32
    %74 = arith.addi %0, %c5_i32_55 : i32
    %75 = arith.index_cast %74 : i32 to index
    %76 = memref.load %arg2[%75] : memref<16xi32, #tpu.memory_space<smem>>
    %c0_i32_56 = arith.constant 0 : i32
    %c5_i32_57 = arith.constant 5 : i32
    %c0_i32_58 = arith.constant 0 : i32
    %77 = tpu.memref_slice %arg3[%73, %c0_i32_58] : memref<64x32xf32, #tpu.memory_space<any>> -> memref<1x32xf32, #tpu.memory_space<any>>
    %c5_i32_59 = arith.constant 5 : i32
    %c0_i32_60 = arith.constant 0 : i32
    %78 = tpu.memref_slice %arg9[%c5_i32_59, %c0_i32_60] : memref<8x32xf32, #tpu.memory_space<vmem>> -> memref<1x32xf32, #tpu.memory_space<vmem>>
    %79 = tpu.memref_slice %arg11[%c0_i32_56, %c5_i32_57] : memref<2x8x!tpu.dma_semaphore, #tpu.memory_space<semaphore_mem>> -> memref<1x1x!tpu.dma_semaphore, #tpu.memory_space<semaphore_mem>>
    %80 = tpu.memref_squeeze %79 : memref<1x1x!tpu.dma_semaphore, #tpu.memory_space<semaphore_mem>> -> memref<!tpu.dma_semaphore, #tpu.memory_space<semaphore_mem>>
    tpu.enqueue_dma source(%77 : memref<1x32xf32, #tpu.memory_space<any>>) target(%78 : memref<1x32xf32, #tpu.memory_space<vmem>>) target_semaphore(%80 : memref<!tpu.dma_semaphore, #tpu.memory_space<semaphore_mem>>)
    %c1_i32_61 = arith.constant 1 : i32
    %c5_i32_62 = arith.constant 5 : i32
    %c0_i32_63 = arith.constant 0 : i32
    %81 = tpu.memref_slice %arg4[%76, %c0_i32_63] : memref<24x32xf32, #tpu.memory_space<any>> -> memref<1x32xf32, #tpu.memory_space<any>>
    %c5_i32_64 = arith.constant 5 : i32
    %c0_i32_65 = arith.constant 0 : i32
    %82 = tpu.memref_slice %arg10[%c5_i32_64, %c0_i32_65] : memref<8x32xf32, #tpu.memory_space<vmem>> -> memref<1x32xf32, #tpu.memory_space<vmem>>
    %83 = tpu.memref_slice %arg11[%c1_i32_61, %c5_i32_62] : memref<2x8x!tpu.dma_semaphore, #tpu.memory_space<semaphore_mem>> -> memref<1x1x!tpu.dma_semaphore, #tpu.memory_space<semaphore_mem>>
    %84 = tpu.memref_squeeze %83 : memref<1x1x!tpu.dma_semaphore, #tpu.memory_space<semaphore_mem>> -> memref<!tpu.dma_semaphore, #tpu.memory_space<semaphore_mem>>
    tpu.enqueue_dma source(%81 : memref<1x32xf32, #tpu.memory_space<any>>) target(%82 : memref<1x32xf32, #tpu.memory_space<vmem>>) target_semaphore(%84 : memref<!tpu.dma_semaphore, #tpu.memory_space<semaphore_mem>>)
    %c6_i32 = arith.constant 6 : i32
    %85 = arith.addi %0, %c6_i32 : i32
    %86 = arith.index_cast %85 : i32 to index
    %87 = memref.load %arg1[%86] : memref<16xi32, #tpu.memory_space<smem>>
    %c6_i32_66 = arith.constant 6 : i32
    %88 = arith.addi %0, %c6_i32_66 : i32
    %89 = arith.index_cast %88 : i32 to index
    %90 = memref.load %arg2[%89] : memref<16xi32, #tpu.memory_space<smem>>
    %c0_i32_67 = arith.constant 0 : i32
    %c6_i32_68 = arith.constant 6 : i32
    %c0_i32_69 = arith.constant 0 : i32
    %91 = tpu.memref_slice %arg3[%87, %c0_i32_69] : memref<64x32xf32, #tpu.memory_space<any>> -> memref<1x32xf32, #tpu.memory_space<any>>
    %c6_i32_70 = arith.constant 6 : i32
    %c0_i32_71 = arith.constant 0 : i32
    %92 = tpu.memref_slice %arg9[%c6_i32_70, %c0_i32_71] : memref<8x32xf32, #tpu.memory_space<vmem>> -> memref<1x32xf32, #tpu.memory_space<vmem>>
    %93 = tpu.memref_slice %arg11[%c0_i32_67, %c6_i32_68] : memref<2x8x!tpu.dma_semaphore, #tpu.memory_space<semaphore_mem>> -> memref<1x1x!tpu.dma_semaphore, #tpu.memory_space<semaphore_mem>>
    %94 = tpu.memref_squeeze %93 : memref<1x1x!tpu.dma_semaphore, #tpu.memory_space<semaphore_mem>> -> memref<!tpu.dma_semaphore, #tpu.memory_space<semaphore_mem>>
    tpu.enqueue_dma source(%91 : memref<1x32xf32, #tpu.memory_space<any>>) target(%92 : memref<1x32xf32, #tpu.memory_space<vmem>>) target_semaphore(%94 : memref<!tpu.dma_semaphore, #tpu.memory_space<semaphore_mem>>)
    %c1_i32_72 = arith.constant 1 : i32
    %c6_i32_73 = arith.constant 6 : i32
    %c0_i32_74 = arith.constant 0 : i32
    %95 = tpu.memref_slice %arg4[%90, %c0_i32_74] : memref<24x32xf32, #tpu.memory_space<any>> -> memref<1x32xf32, #tpu.memory_space<any>>
    %c6_i32_75 = arith.constant 6 : i32
    %c0_i32_76 = arith.constant 0 : i32
    %96 = tpu.memref_slice %arg10[%c6_i32_75, %c0_i32_76] : memref<8x32xf32, #tpu.memory_space<vmem>> -> memref<1x32xf32, #tpu.memory_space<vmem>>
    %97 = tpu.memref_slice %arg11[%c1_i32_72, %c6_i32_73] : memref<2x8x!tpu.dma_semaphore, #tpu.memory_space<semaphore_mem>> -> memref<1x1x!tpu.dma_semaphore, #tpu.memory_space<semaphore_mem>>
    %98 = tpu.memref_squeeze %97 : memref<1x1x!tpu.dma_semaphore, #tpu.memory_space<semaphore_mem>> -> memref<!tpu.dma_semaphore, #tpu.memory_space<semaphore_mem>>
    tpu.enqueue_dma source(%95 : memref<1x32xf32, #tpu.memory_space<any>>) target(%96 : memref<1x32xf32, #tpu.memory_space<vmem>>) target_semaphore(%98 : memref<!tpu.dma_semaphore, #tpu.memory_space<semaphore_mem>>)
    %c7_i32 = arith.constant 7 : i32
    %99 = arith.addi %0, %c7_i32 : i32
    %100 = arith.index_cast %99 : i32 to index
    %101 = memref.load %arg1[%100] : memref<16xi32, #tpu.memory_space<smem>>
    %c7_i32_77 = arith.constant 7 : i32
    %102 = arith.addi %0, %c7_i32_77 : i32
    %103 = arith.index_cast %102 : i32 to index
    %104 = memref.load %arg2[%103] : memref<16xi32, #tpu.memory_space<smem>>
    %c0_i32_78 = arith.constant 0 : i32
    %c7_i32_79 = arith.constant 7 : i32
    %c0_i32_80 = arith.constant 0 : i32
    %105 = tpu.memref_slice %arg3[%101, %c0_i32_80] : memref<64x32xf32, #tpu.memory_space<any>> -> memref<1x32xf32, #tpu.memory_space<any>>
    %c7_i32_81 = arith.constant 7 : i32
    %c0_i32_82 = arith.constant 0 : i32
    %106 = tpu.memref_slice %arg9[%c7_i32_81, %c0_i32_82] : memref<8x32xf32, #tpu.memory_space<vmem>> -> memref<1x32xf32, #tpu.memory_space<vmem>>
    %107 = tpu.memref_slice %arg11[%c0_i32_78, %c7_i32_79] : memref<2x8x!tpu.dma_semaphore, #tpu.memory_space<semaphore_mem>> -> memref<1x1x!tpu.dma_semaphore, #tpu.memory_space<semaphore_mem>>
    %108 = tpu.memref_squeeze %107 : memref<1x1x!tpu.dma_semaphore, #tpu.memory_space<semaphore_mem>> -> memref<!tpu.dma_semaphore, #tpu.memory_space<semaphore_mem>>
    tpu.enqueue_dma source(%105 : memref<1x32xf32, #tpu.memory_space<any>>) target(%106 : memref<1x32xf32, #tpu.memory_space<vmem>>) target_semaphore(%108 : memref<!tpu.dma_semaphore, #tpu.memory_space<semaphore_mem>>)
    %c1_i32_83 = arith.constant 1 : i32
    %c7_i32_84 = arith.constant 7 : i32
    %c0_i32_85 = arith.constant 0 : i32
    %109 = tpu.memref_slice %arg4[%104, %c0_i32_85] : memref<24x32xf32, #tpu.memory_space<any>> -> memref<1x32xf32, #tpu.memory_space<any>>
    %c7_i32_86 = arith.constant 7 : i32
    %c0_i32_87 = arith.constant 0 : i32
    %110 = tpu.memref_slice %arg10[%c7_i32_86, %c0_i32_87] : memref<8x32xf32, #tpu.memory_space<vmem>> -> memref<1x32xf32, #tpu.memory_space<vmem>>
    %111 = tpu.memref_slice %arg11[%c1_i32_83, %c7_i32_84] : memref<2x8x!tpu.dma_semaphore, #tpu.memory_space<semaphore_mem>> -> memref<1x1x!tpu.dma_semaphore, #tpu.memory_space<semaphore_mem>>
    %112 = tpu.memref_squeeze %111 : memref<1x1x!tpu.dma_semaphore, #tpu.memory_space<semaphore_mem>> -> memref<!tpu.dma_semaphore, #tpu.memory_space<semaphore_mem>>
    tpu.enqueue_dma source(%109 : memref<1x32xf32, #tpu.memory_space<any>>) target(%110 : memref<1x32xf32, #tpu.memory_space<vmem>>) target_semaphore(%112 : memref<!tpu.dma_semaphore, #tpu.memory_space<semaphore_mem>>)
    %c0_i32_88 = arith.constant 0 : i32
    %c0_i32_89 = arith.constant 0 : i32
    %c0_i32_90 = arith.constant 0 : i32
    %113 = tpu.memref_slice %arg3[%3, %c0_i32_90] : memref<64x32xf32, #tpu.memory_space<any>> -> memref<1x32xf32, #tpu.memory_space<any>>
    %c0_i32_91 = arith.constant 0 : i32
    %c0_i32_92 = arith.constant 0 : i32
    %114 = tpu.memref_slice %arg9[%c0_i32_91, %c0_i32_92] : memref<8x32xf32, #tpu.memory_space<vmem>> -> memref<1x32xf32, #tpu.memory_space<vmem>>
    %115 = tpu.memref_slice %arg11[%c0_i32_88, %c0_i32_89] : memref<2x8x!tpu.dma_semaphore, #tpu.memory_space<semaphore_mem>> -> memref<1x1x!tpu.dma_semaphore, #tpu.memory_space<semaphore_mem>>
    %116 = tpu.memref_squeeze %115 : memref<1x1x!tpu.dma_semaphore, #tpu.memory_space<semaphore_mem>> -> memref<!tpu.dma_semaphore, #tpu.memory_space<semaphore_mem>>
    tpu.wait_dma2 semaphore(%116 : memref<!tpu.dma_semaphore, #tpu.memory_space<semaphore_mem>>) src(%113 : memref<1x32xf32, #tpu.memory_space<any>>) dst(%114 : memref<1x32xf32, #tpu.memory_space<vmem>>)
    %c1_i32_93 = arith.constant 1 : i32
    %c0_i32_94 = arith.constant 0 : i32
    %c0_i32_95 = arith.constant 0 : i32
    %117 = tpu.memref_slice %arg4[%6, %c0_i32_95] : memref<24x32xf32, #tpu.memory_space<any>> -> memref<1x32xf32, #tpu.memory_space<any>>
    %c0_i32_96 = arith.constant 0 : i32
    %c0_i32_97 = arith.constant 0 : i32
    %118 = tpu.memref_slice %arg10[%c0_i32_96, %c0_i32_97] : memref<8x32xf32, #tpu.memory_space<vmem>> -> memref<1x32xf32, #tpu.memory_space<vmem>>
    %119 = tpu.memref_slice %arg11[%c1_i32_93, %c0_i32_94] : memref<2x8x!tpu.dma_semaphore, #tpu.memory_space<semaphore_mem>> -> memref<1x1x!tpu.dma_semaphore, #tpu.memory_space<semaphore_mem>>
    %120 = tpu.memref_squeeze %119 : memref<1x1x!tpu.dma_semaphore, #tpu.memory_space<semaphore_mem>> -> memref<!tpu.dma_semaphore, #tpu.memory_space<semaphore_mem>>
    tpu.wait_dma2 semaphore(%120 : memref<!tpu.dma_semaphore, #tpu.memory_space<semaphore_mem>>) src(%117 : memref<1x32xf32, #tpu.memory_space<any>>) dst(%118 : memref<1x32xf32, #tpu.memory_space<vmem>>)
    %c0_i32_98 = arith.constant 0 : i32
    %c1_i32_99 = arith.constant 1 : i32
    %c0_i32_100 = arith.constant 0 : i32
    %121 = tpu.memref_slice %arg3[%17, %c0_i32_100] : memref<64x32xf32, #tpu.memory_space<any>> -> memref<1x32xf32, #tpu.memory_space<any>>
    %c1_i32_101 = arith.constant 1 : i32
    %c0_i32_102 = arith.constant 0 : i32
    %122 = tpu.memref_slice %arg9[%c1_i32_101, %c0_i32_102] : memref<8x32xf32, #tpu.memory_space<vmem>> -> memref<1x32xf32, #tpu.memory_space<vmem>>
    %123 = tpu.memref_slice %arg11[%c0_i32_98, %c1_i32_99] : memref<2x8x!tpu.dma_semaphore, #tpu.memory_space<semaphore_mem>> -> memref<1x1x!tpu.dma_semaphore, #tpu.memory_space<semaphore_mem>>
    %124 = tpu.memref_squeeze %123 : memref<1x1x!tpu.dma_semaphore, #tpu.memory_space<semaphore_mem>> -> memref<!tpu.dma_semaphore, #tpu.memory_space<semaphore_mem>>
    tpu.wait_dma2 semaphore(%124 : memref<!tpu.dma_semaphore, #tpu.memory_space<semaphore_mem>>) src(%121 : memref<1x32xf32, #tpu.memory_space<any>>) dst(%122 : memref<1x32xf32, #tpu.memory_space<vmem>>)
    %c1_i32_103 = arith.constant 1 : i32
    %c1_i32_104 = arith.constant 1 : i32
    %c0_i32_105 = arith.constant 0 : i32
    %125 = tpu.memref_slice %arg4[%20, %c0_i32_105] : memref<24x32xf32, #tpu.memory_space<any>> -> memref<1x32xf32, #tpu.memory_space<any>>
    %c1_i32_106 = arith.constant 1 : i32
    %c0_i32_107 = arith.constant 0 : i32
    %126 = tpu.memref_slice %arg10[%c1_i32_106, %c0_i32_107] : memref<8x32xf32, #tpu.memory_space<vmem>> -> memref<1x32xf32, #tpu.memory_space<vmem>>
    %127 = tpu.memref_slice %arg11[%c1_i32_103, %c1_i32_104] : memref<2x8x!tpu.dma_semaphore, #tpu.memory_space<semaphore_mem>> -> memref<1x1x!tpu.dma_semaphore, #tpu.memory_space<semaphore_mem>>
    %128 = tpu.memref_squeeze %127 : memref<1x1x!tpu.dma_semaphore, #tpu.memory_space<semaphore_mem>> -> memref<!tpu.dma_semaphore, #tpu.memory_space<semaphore_mem>>
    tpu.wait_dma2 semaphore(%128 : memref<!tpu.dma_semaphore, #tpu.memory_space<semaphore_mem>>) src(%125 : memref<1x32xf32, #tpu.memory_space<any>>) dst(%126 : memref<1x32xf32, #tpu.memory_space<vmem>>)
    %c0_i32_108 = arith.constant 0 : i32
    %c2_i32_109 = arith.constant 2 : i32
    %c0_i32_110 = arith.constant 0 : i32
    %129 = tpu.memref_slice %arg3[%31, %c0_i32_110] : memref<64x32xf32, #tpu.memory_space<any>> -> memref<1x32xf32, #tpu.memory_space<any>>
    %c2_i32_111 = arith.constant 2 : i32
    %c0_i32_112 = arith.constant 0 : i32
    %130 = tpu.memref_slice %arg9[%c2_i32_111, %c0_i32_112] : memref<8x32xf32, #tpu.memory_space<vmem>> -> memref<1x32xf32, #tpu.memory_space<vmem>>
    %131 = tpu.memref_slice %arg11[%c0_i32_108, %c2_i32_109] : memref<2x8x!tpu.dma_semaphore, #tpu.memory_space<semaphore_mem>> -> memref<1x1x!tpu.dma_semaphore, #tpu.memory_space<semaphore_mem>>
    %132 = tpu.memref_squeeze %131 : memref<1x1x!tpu.dma_semaphore, #tpu.memory_space<semaphore_mem>> -> memref<!tpu.dma_semaphore, #tpu.memory_space<semaphore_mem>>
    tpu.wait_dma2 semaphore(%132 : memref<!tpu.dma_semaphore, #tpu.memory_space<semaphore_mem>>) src(%129 : memref<1x32xf32, #tpu.memory_space<any>>) dst(%130 : memref<1x32xf32, #tpu.memory_space<vmem>>)
    %c1_i32_113 = arith.constant 1 : i32
    %c2_i32_114 = arith.constant 2 : i32
    %c0_i32_115 = arith.constant 0 : i32
    %133 = tpu.memref_slice %arg4[%34, %c0_i32_115] : memref<24x32xf32, #tpu.memory_space<any>> -> memref<1x32xf32, #tpu.memory_space<any>>
    %c2_i32_116 = arith.constant 2 : i32
    %c0_i32_117 = arith.constant 0 : i32
    %134 = tpu.memref_slice %arg10[%c2_i32_116, %c0_i32_117] : memref<8x32xf32, #tpu.memory_space<vmem>> -> memref<1x32xf32, #tpu.memory_space<vmem>>
    %135 = tpu.memref_slice %arg11[%c1_i32_113, %c2_i32_114] : memref<2x8x!tpu.dma_semaphore, #tpu.memory_space<semaphore_mem>> -> memref<1x1x!tpu.dma_semaphore, #tpu.memory_space<semaphore_mem>>
    %136 = tpu.memref_squeeze %135 : memref<1x1x!tpu.dma_semaphore, #tpu.memory_space<semaphore_mem>> -> memref<!tpu.dma_semaphore, #tpu.memory_space<semaphore_mem>>
    tpu.wait_dma2 semaphore(%136 : memref<!tpu.dma_semaphore, #tpu.memory_space<semaphore_mem>>) src(%133 : memref<1x32xf32, #tpu.memory_space<any>>) dst(%134 : memref<1x32xf32, #tpu.memory_space<vmem>>)
    %c0_i32_118 = arith.constant 0 : i32
    %c3_i32_119 = arith.constant 3 : i32
    %c0_i32_120 = arith.constant 0 : i32
    %137 = tpu.memref_slice %arg3[%45, %c0_i32_120] : memref<64x32xf32, #tpu.memory_space<any>> -> memref<1x32xf32, #tpu.memory_space<any>>
    %c3_i32_121 = arith.constant 3 : i32
    %c0_i32_122 = arith.constant 0 : i32
    %138 = tpu.memref_slice %arg9[%c3_i32_121, %c0_i32_122] : memref<8x32xf32, #tpu.memory_space<vmem>> -> memref<1x32xf32, #tpu.memory_space<vmem>>
    %139 = tpu.memref_slice %arg11[%c0_i32_118, %c3_i32_119] : memref<2x8x!tpu.dma_semaphore, #tpu.memory_space<semaphore_mem>> -> memref<1x1x!tpu.dma_semaphore, #tpu.memory_space<semaphore_mem>>
    %140 = tpu.memref_squeeze %139 : memref<1x1x!tpu.dma_semaphore, #tpu.memory_space<semaphore_mem>> -> memref<!tpu.dma_semaphore, #tpu.memory_space<semaphore_mem>>
    tpu.wait_dma2 semaphore(%140 : memref<!tpu.dma_semaphore, #tpu.memory_space<semaphore_mem>>) src(%137 : memref<1x32xf32, #tpu.memory_space<any>>) dst(%138 : memref<1x32xf32, #tpu.memory_space<vmem>>)
    %c1_i32_123 = arith.constant 1 : i32
    %c3_i32_124 = arith.constant 3 : i32
    %c0_i32_125 = arith.constant 0 : i32
    %141 = tpu.memref_slice %arg4[%48, %c0_i32_125] : memref<24x32xf32, #tpu.memory_space<any>> -> memref<1x32xf32, #tpu.memory_space<any>>
    %c3_i32_126 = arith.constant 3 : i32
    %c0_i32_127 = arith.constant 0 : i32
    %142 = tpu.memref_slice %arg10[%c3_i32_126, %c0_i32_127] : memref<8x32xf32, #tpu.memory_space<vmem>> -> memref<1x32xf32, #tpu.memory_space<vmem>>
    %143 = tpu.memref_slice %arg11[%c1_i32_123, %c3_i32_124] : memref<2x8x!tpu.dma_semaphore, #tpu.memory_space<semaphore_mem>> -> memref<1x1x!tpu.dma_semaphore, #tpu.memory_space<semaphore_mem>>
    %144 = tpu.memref_squeeze %143 : memref<1x1x!tpu.dma_semaphore, #tpu.memory_space<semaphore_mem>> -> memref<!tpu.dma_semaphore, #tpu.memory_space<semaphore_mem>>
    tpu.wait_dma2 semaphore(%144 : memref<!tpu.dma_semaphore, #tpu.memory_space<semaphore_mem>>) src(%141 : memref<1x32xf32, #tpu.memory_space<any>>) dst(%142 : memref<1x32xf32, #tpu.memory_space<vmem>>)
    %c0_i32_128 = arith.constant 0 : i32
    %c4_i32_129 = arith.constant 4 : i32
    %c0_i32_130 = arith.constant 0 : i32
    %145 = tpu.memref_slice %arg3[%59, %c0_i32_130] : memref<64x32xf32, #tpu.memory_space<any>> -> memref<1x32xf32, #tpu.memory_space<any>>
    %c4_i32_131 = arith.constant 4 : i32
    %c0_i32_132 = arith.constant 0 : i32
    %146 = tpu.memref_slice %arg9[%c4_i32_131, %c0_i32_132] : memref<8x32xf32, #tpu.memory_space<vmem>> -> memref<1x32xf32, #tpu.memory_space<vmem>>
    %147 = tpu.memref_slice %arg11[%c0_i32_128, %c4_i32_129] : memref<2x8x!tpu.dma_semaphore, #tpu.memory_space<semaphore_mem>> -> memref<1x1x!tpu.dma_semaphore, #tpu.memory_space<semaphore_mem>>
    %148 = tpu.memref_squeeze %147 : memref<1x1x!tpu.dma_semaphore, #tpu.memory_space<semaphore_mem>> -> memref<!tpu.dma_semaphore, #tpu.memory_space<semaphore_mem>>
    tpu.wait_dma2 semaphore(%148 : memref<!tpu.dma_semaphore, #tpu.memory_space<semaphore_mem>>) src(%145 : memref<1x32xf32, #tpu.memory_space<any>>) dst(%146 : memref<1x32xf32, #tpu.memory_space<vmem>>)
    %c1_i32_133 = arith.constant 1 : i32
    %c4_i32_134 = arith.constant 4 : i32
    %c0_i32_135 = arith.constant 0 : i32
    %149 = tpu.memref_slice %arg4[%62, %c0_i32_135] : memref<24x32xf32, #tpu.memory_space<any>> -> memref<1x32xf32, #tpu.memory_space<any>>
    %c4_i32_136 = arith.constant 4 : i32
    %c0_i32_137 = arith.constant 0 : i32
    %150 = tpu.memref_slice %arg10[%c4_i32_136, %c0_i32_137] : memref<8x32xf32, #tpu.memory_space<vmem>> -> memref<1x32xf32, #tpu.memory_space<vmem>>
    %151 = tpu.memref_slice %arg11[%c1_i32_133, %c4_i32_134] : memref<2x8x!tpu.dma_semaphore, #tpu.memory_space<semaphore_mem>> -> memref<1x1x!tpu.dma_semaphore, #tpu.memory_space<semaphore_mem>>
    %152 = tpu.memref_squeeze %151 : memref<1x1x!tpu.dma_semaphore, #tpu.memory_space<semaphore_mem>> -> memref<!tpu.dma_semaphore, #tpu.memory_space<semaphore_mem>>
    tpu.wait_dma2 semaphore(%152 : memref<!tpu.dma_semaphore, #tpu.memory_space<semaphore_mem>>) src(%149 : memref<1x32xf32, #tpu.memory_space<any>>) dst(%150 : memref<1x32xf32, #tpu.memory_space<vmem>>)
    %c0_i32_138 = arith.constant 0 : i32
    %c5_i32_139 = arith.constant 5 : i32
    %c0_i32_140 = arith.constant 0 : i32
    %153 = tpu.memref_slice %arg3[%73, %c0_i32_140] : memref<64x32xf32, #tpu.memory_space<any>> -> memref<1x32xf32, #tpu.memory_space<any>>
    %c5_i32_141 = arith.constant 5 : i32
    %c0_i32_142 = arith.constant 0 : i32
    %154 = tpu.memref_slice %arg9[%c5_i32_141, %c0_i32_142] : memref<8x32xf32, #tpu.memory_space<vmem>> -> memref<1x32xf32, #tpu.memory_space<vmem>>
    %155 = tpu.memref_slice %arg11[%c0_i32_138, %c5_i32_139] : memref<2x8x!tpu.dma_semaphore, #tpu.memory_space<semaphore_mem>> -> memref<1x1x!tpu.dma_semaphore, #tpu.memory_space<semaphore_mem>>
    %156 = tpu.memref_squeeze %155 : memref<1x1x!tpu.dma_semaphore, #tpu.memory_space<semaphore_mem>> -> memref<!tpu.dma_semaphore, #tpu.memory_space<semaphore_mem>>
    tpu.wait_dma2 semaphore(%156 : memref<!tpu.dma_semaphore, #tpu.memory_space<semaphore_mem>>) src(%153 : memref<1x32xf32, #tpu.memory_space<any>>) dst(%154 : memref<1x32xf32, #tpu.memory_space<vmem>>)
    %c1_i32_143 = arith.constant 1 : i32
    %c5_i32_144 = arith.constant 5 : i32
    %c0_i32_145 = arith.constant 0 : i32
    %157 = tpu.memref_slice %arg4[%76, %c0_i32_145] : memref<24x32xf32, #tpu.memory_space<any>> -> memref<1x32xf32, #tpu.memory_space<any>>
    %c5_i32_146 = arith.constant 5 : i32
    %c0_i32_147 = arith.constant 0 : i32
    %158 = tpu.memref_slice %arg10[%c5_i32_146, %c0_i32_147] : memref<8x32xf32, #tpu.memory_space<vmem>> -> memref<1x32xf32, #tpu.memory_space<vmem>>
    %159 = tpu.memref_slice %arg11[%c1_i32_143, %c5_i32_144] : memref<2x8x!tpu.dma_semaphore, #tpu.memory_space<semaphore_mem>> -> memref<1x1x!tpu.dma_semaphore, #tpu.memory_space<semaphore_mem>>
    %160 = tpu.memref_squeeze %159 : memref<1x1x!tpu.dma_semaphore, #tpu.memory_space<semaphore_mem>> -> memref<!tpu.dma_semaphore, #tpu.memory_space<semaphore_mem>>
    tpu.wait_dma2 semaphore(%160 : memref<!tpu.dma_semaphore, #tpu.memory_space<semaphore_mem>>) src(%157 : memref<1x32xf32, #tpu.memory_space<any>>) dst(%158 : memref<1x32xf32, #tpu.memory_space<vmem>>)
    %c0_i32_148 = arith.constant 0 : i32
    %c6_i32_149 = arith.constant 6 : i32
    %c0_i32_150 = arith.constant 0 : i32
    %161 = tpu.memref_slice %arg3[%87, %c0_i32_150] : memref<64x32xf32, #tpu.memory_space<any>> -> memref<1x32xf32, #tpu.memory_space<any>>
    %c6_i32_151 = arith.constant 6 : i32
    %c0_i32_152 = arith.constant 0 : i32
    %162 = tpu.memref_slice %arg9[%c6_i32_151, %c0_i32_152] : memref<8x32xf32, #tpu.memory_space<vmem>> -> memref<1x32xf32, #tpu.memory_space<vmem>>
    %163 = tpu.memref_slice %arg11[%c0_i32_148, %c6_i32_149] : memref<2x8x!tpu.dma_semaphore, #tpu.memory_space<semaphore_mem>> -> memref<1x1x!tpu.dma_semaphore, #tpu.memory_space<semaphore_mem>>
    %164 = tpu.memref_squeeze %163 : memref<1x1x!tpu.dma_semaphore, #tpu.memory_space<semaphore_mem>> -> memref<!tpu.dma_semaphore, #tpu.memory_space<semaphore_mem>>
    tpu.wait_dma2 semaphore(%164 : memref<!tpu.dma_semaphore, #tpu.memory_space<semaphore_mem>>) src(%161 : memref<1x32xf32, #tpu.memory_space<any>>) dst(%162 : memref<1x32xf32, #tpu.memory_space<vmem>>)
    %c1_i32_153 = arith.constant 1 : i32
    %c6_i32_154 = arith.constant 6 : i32
    %c0_i32_155 = arith.constant 0 : i32
    %165 = tpu.memref_slice %arg4[%90, %c0_i32_155] : memref<24x32xf32, #tpu.memory_space<any>> -> memref<1x32xf32, #tpu.memory_space<any>>
    %c6_i32_156 = arith.constant 6 : i32
    %c0_i32_157 = arith.constant 0 : i32
    %166 = tpu.memref_slice %arg10[%c6_i32_156, %c0_i32_157] : memref<8x32xf32, #tpu.memory_space<vmem>> -> memref<1x32xf32, #tpu.memory_space<vmem>>
    %167 = tpu.memref_slice %arg11[%c1_i32_153, %c6_i32_154] : memref<2x8x!tpu.dma_semaphore, #tpu.memory_space<semaphore_mem>> -> memref<1x1x!tpu.dma_semaphore, #tpu.memory_space<semaphore_mem>>
    %168 = tpu.memref_squeeze %167 : memref<1x1x!tpu.dma_semaphore, #tpu.memory_space<semaphore_mem>> -> memref<!tpu.dma_semaphore, #tpu.memory_space<semaphore_mem>>
    tpu.wait_dma2 semaphore(%168 : memref<!tpu.dma_semaphore, #tpu.memory_space<semaphore_mem>>) src(%165 : memref<1x32xf32, #tpu.memory_space<any>>) dst(%166 : memref<1x32xf32, #tpu.memory_space<vmem>>)
    %c0_i32_158 = arith.constant 0 : i32
    %c7_i32_159 = arith.constant 7 : i32
    %c0_i32_160 = arith.constant 0 : i32
    %169 = tpu.memref_slice %arg3[%101, %c0_i32_160] : memref<64x32xf32, #tpu.memory_space<any>> -> memref<1x32xf32, #tpu.memory_space<any>>
    %c7_i32_161 = arith.constant 7 : i32
    %c0_i32_162 = arith.constant 0 : i32
    %170 = tpu.memref_slice %arg9[%c7_i32_161, %c0_i32_162] : memref<8x32xf32, #tpu.memory_space<vmem>> -> memref<1x32xf32, #tpu.memory_space<vmem>>
    %171 = tpu.memref_slice %arg11[%c0_i32_158, %c7_i32_159] : memref<2x8x!tpu.dma_semaphore, #tpu.memory_space<semaphore_mem>> -> memref<1x1x!tpu.dma_semaphore, #tpu.memory_space<semaphore_mem>>
    %172 = tpu.memref_squeeze %171 : memref<1x1x!tpu.dma_semaphore, #tpu.memory_space<semaphore_mem>> -> memref<!tpu.dma_semaphore, #tpu.memory_space<semaphore_mem>>
    tpu.wait_dma2 semaphore(%172 : memref<!tpu.dma_semaphore, #tpu.memory_space<semaphore_mem>>) src(%169 : memref<1x32xf32, #tpu.memory_space<any>>) dst(%170 : memref<1x32xf32, #tpu.memory_space<vmem>>)
    %c1_i32_163 = arith.constant 1 : i32
    %c7_i32_164 = arith.constant 7 : i32
    %c0_i32_165 = arith.constant 0 : i32
    %173 = tpu.memref_slice %arg4[%104, %c0_i32_165] : memref<24x32xf32, #tpu.memory_space<any>> -> memref<1x32xf32, #tpu.memory_space<any>>
    %c7_i32_166 = arith.constant 7 : i32
    %c0_i32_167 = arith.constant 0 : i32
    %174 = tpu.memref_slice %arg10[%c7_i32_166, %c0_i32_167] : memref<8x32xf32, #tpu.memory_space<vmem>> -> memref<1x32xf32, #tpu.memory_space<vmem>>
    %175 = tpu.memref_slice %arg11[%c1_i32_163, %c7_i32_164] : memref<2x8x!tpu.dma_semaphore, #tpu.memory_space<semaphore_mem>> -> memref<1x1x!tpu.dma_semaphore, #tpu.memory_space<semaphore_mem>>
    %176 = tpu.memref_squeeze %175 : memref<1x1x!tpu.dma_semaphore, #tpu.memory_space<semaphore_mem>> -> memref<!tpu.dma_semaphore, #tpu.memory_space<semaphore_mem>>
    tpu.wait_dma2 semaphore(%176 : memref<!tpu.dma_semaphore, #tpu.memory_space<semaphore_mem>>) src(%173 : memref<1x32xf32, #tpu.memory_space<any>>) dst(%174 : memref<1x32xf32, #tpu.memory_space<vmem>>)
    %c0 = arith.constant 0 : index
    %c0_168 = arith.constant 0 : index
    %177 = vector.load %arg9[%c0, %c0_168] : memref<8x32xf32, #tpu.memory_space<vmem>>, vector<8x32xf32>
    %c0_169 = arith.constant 0 : index
    %c0_170 = arith.constant 0 : index
    %178 = vector.load %arg10[%c0_169, %c0_170] : memref<8x32xf32, #tpu.memory_space<vmem>>, vector<8x32xf32>
    %179 = arith.addf %177, %178 : vector<8x32xf32>
    %c0_171 = arith.constant 0 : index
    %c0_172 = arith.constant 0 : index
    %180 = vector.load %arg5[%c0_171, %c0_172] : memref<1x32xf32, #tpu.memory_space<vmem>>, vector<1x32xf32>
    %181 = vector.broadcast %180 : vector<1x32xf32> to vector<8x32xf32>
    %182 = arith.addf %179, %181 : vector<8x32xf32>
    %cst = arith.constant dense<0.000000e+00> : vector<8xf32>
    %183 = vector.multi_reduction <add>, %182, %cst [1] : vector<8x32xf32> to vector<8xf32>
    %184 = vector.shape_cast %183 : vector<8xf32> to vector<8x1xf32>
    %185 = arith.mulf %182, %182 : vector<8x32xf32>
    %cst_173 = arith.constant dense<0.000000e+00> : vector<8xf32>
    %186 = vector.multi_reduction <add>, %185, %cst_173 [1] : vector<8x32xf32> to vector<8xf32>
    %187 = vector.shape_cast %186 : vector<8xf32> to vector<8x1xf32>
    %cst_174 = arith.constant 3.125000e-02 : f32
    %188 = vector.broadcast %cst_174 : f32 to vector<8x1xf32>
    %189 = arith.mulf %184, %188 : vector<8x1xf32>
    %cst_175 = arith.constant 3.125000e-02 : f32
    %190 = vector.broadcast %cst_175 : f32 to vector<8x1xf32>
    %191 = arith.mulf %187, %190 : vector<8x1xf32>
    %192 = arith.mulf %189, %189 : vector<8x1xf32>
    %193 = arith.subf %191, %192 : vector<8x1xf32>
    %cst_176 = arith.constant 9.99999974E-6 : f32
    %194 = vector.broadcast %cst_176 : f32 to vector<8x1xf32>
    %195 = arith.addf %193, %194 : vector<8x1xf32>
    %196 = math.rsqrt %195 : vector<8x1xf32>
    %197 = vector.broadcast %189 : vector<8x1xf32> to vector<8x32xf32>
    %198 = arith.subf %182, %197 : vector<8x32xf32>
    %199 = vector.broadcast %196 : vector<8x1xf32> to vector<8x32xf32>
    %200 = arith.mulf %198, %199 : vector<8x32xf32>
    %c0_177 = arith.constant 0 : index
    %c0_178 = arith.constant 0 : index
    %201 = vector.load %arg6[%c0_177, %c0_178] : memref<1x32xf32, #tpu.memory_space<vmem>>, vector<1x32xf32>
    %202 = vector.broadcast %201 : vector<1x32xf32> to vector<8x32xf32>
    %203 = arith.mulf %200, %202 : vector<8x32xf32>
    %c0_179 = arith.constant 0 : index
    %c0_180 = arith.constant 0 : index
    %204 = vector.load %arg7[%c0_179, %c0_180] : memref<1x32xf32, #tpu.memory_space<vmem>>, vector<1x32xf32>
    %205 = vector.broadcast %204 : vector<1x32xf32> to vector<8x32xf32>
    %206 = arith.addf %203, %205 : vector<8x32xf32>
    %c0_181 = arith.constant 0 : index
    %c0_182 = arith.constant 0 : index
    %207 = vector.load %arg8[%c0_181, %c0_182] : memref<8x32xf32, #tpu.memory_space<vmem>>, vector<8x32xf32>
    tpu.vector_store %arg8[%c0_181, %c0_182], %206 {strides = array<i32>} : memref<8x32xf32, #tpu.memory_space<vmem>>, vector<8x32xf32>,
    return
  }
  func.func @transform_2(%arg0: i32, %arg1: memref<16xi32, #tpu.memory_space<smem>>, %arg2: memref<16xi32, #tpu.memory_space<smem>>) -> (i32, i32) {
    %c0_i32 = arith.constant 0 : i32
    %c0_i32_0 = arith.constant 0 : i32
    %c0_i32_1 = arith.constant 0 : i32
    return %c0_i32, %c0_i32_0 : i32, i32
  }
  func.func @transform_3(%arg0: i32, %arg1: memref<16xi32, #tpu.memory_space<smem>>, %arg2: memref<16xi32, #tpu.memory_space<smem>>) -> (i32, i32) {
    %c0_i32 = arith.constant 0 : i32
    %c0_i32_0 = arith.constant 0 : i32
    %c0_i32_1 = arith.constant 0 : i32
    return %c0_i32, %c0_i32_0 : i32, i32
  }
  func.func @transform_4(%arg0: i32, %arg1: memref<16xi32, #tpu.memory_space<smem>>, %arg2: memref<16xi32, #tpu.memory_space<smem>>) -> (i32, i32) {
    %c0_i32 = arith.constant 0 : i32
    %c0_i32_0 = arith.constant 0 : i32
    %c0_i32_1 = arith.constant 0 : i32
    return %c0_i32, %c0_i32_0 : i32, i32
  }
  func.func @transform_5(%arg0: i32, %arg1: memref<16xi32, #tpu.memory_space<smem>>, %arg2: memref<16xi32, #tpu.memory_space<smem>>) -> (i32, i32) {
    %c0_i32 = arith.constant 0 : i32
    %c0_i32_0 = arith.constant 0 : i32
    return %arg0, %c0_i32 : i32, i32
  }
}

</mosaic_0001>

<bundles_post_ra>
// kernel: tpu_custom_call.1
= control target key start
LH: loop header
LB: loop body
LE: loop exit
PB: predicated region body
PF: predicated region fallthrough
CT: control target
= control target key end

     0   :  { %s1812_s0 = inlined_call_operand.vmem [shape: s32[16], index: 0, kind: input, shape index: {}]   ;;  %s1813_s2 = inlined_call_operand.vmem [shape: f32[64,32], index: 2, kind: input, shape index: {}]   ;;  %s1814_s3 = inlined_call_operand.vmem [shape: f32[24,32], index: 3, kind: input, shape index: {}]   ;;  %s1815_s4 = inlined_call_operand.vmem [shape: f32[1,32], index: 4, kind: input, shape index: {}]   ;;  %s1816_s5 = inlined_call_operand.vmem [shape: f32[1,32], index: 5, kind: input, shape index: {}]   ;;  %s1817_s6 = inlined_call_operand.vmem [shape: f32[1,32], index: 6, kind: input, shape index: {}]   ;;  %s1818_s7 = inlined_call_operand.hbm [shape: f32[16,32], index: 7, kind: output, shape index: {}]   ;;  %s1819_s1 = inlined_call_operand.vmem [shape: s32[16], index: 1, kind: input, shape index: {}]  }
   0x1   :  { %s12_s26 = sshll.u32 %s1812_s0, 4  ;;  %s16_s29 = sshll.u32 %s1819_s1, 4  ;;  %s13_s26 = int_to_ptr.vmem [resolvable:$true] %s12_s26  ;;  %s17_s29 = int_to_ptr.vmem [resolvable:$true] %s16_s29 }
   0x2   :  { %s1478_s30 = scalar_lea.vmem %s13_s26, 16  ;;  %p1483_p1 = scmp.lt.s32.totalorder %s13_s26, %s13_s26 }
   0x3   :  { %p1479_p0 = scmp.ne.s32.totalorder %s13_s26, %s1478_s30  ;;  %p1484_p2 = scmp.lt.s32.totalorder %s1478_s30, %s1478_s30 }
   0x5   :  { %p1485_p3 = por %p1484_p2, %p1483_p1 }
   0x7   :  { %p1486_p4 = pnand %p1485_p3, %p1479_p0 }
   0x9   :  { %1489 = shalt.err (!%p1486_p4)  }
   0xa   :  { %s1598_s8 = smov [#allocation6]   ;;  %s1490_s9 = scalar_lea.vmem %s17_s29, 16 }
   0xb   :  { %15 = dma.vmem_to_smem %s13_s26, 16, %s1598_s8, [#allocation5] }
   0xc   :  { %p1491_p5 = scmp.ne.s32.totalorder %s17_s29, %s1490_s9  ;;  %p1495_p6 = scmp.lt.s32.totalorder %s17_s29, %s17_s29 }
   0xd   :  { %p1496_p7 = scmp.lt.s32.totalorder %s1490_s9, %s1490_s9 }
   0xf   :  { %p1497_p8 = por %p1496_p7, %p1495_p6 }
  0x11   :  { %p1498_p9 = pnand %p1497_p8, %p1491_p5 }
  0x13   :  { %1501 = shalt.err (!%p1498_p9)  }
  0x14   :  { %s1599_s0 = smov [#allocation7]  }
  0x15   :  { %19 = dma.vmem_to_smem %s17_s29, 16, %s1599_s0, [#allocation5] }
  0x16   :  { %1544 = dma.done.wait [#allocation5], 32 }
  0x17   :  { %1545 = vsyncadd [#allocation5], 4294967264 }
  0x18   :  { %21 = sfence }
  0x19   :  { %22 = vsyncpa [#allocation9], 0 }
  0x1a   :  { %24 = vsyncpa [#allocation9 + $0x1], 0  ;;  %s1647_s1 = smov 0   ;;  %s1649_s10 = smov 0  }
  0x1b   :  { %s1651_s11 = smov 0   ;;  %s1653_s12 = smov 0  }
  0x1c LB: > { %s1668_s13 = sadd.s32 4294967295, %s1596_s12   ;;  %s1407_s14 = sadd.s32 4294967294, %s1596_s12   ;;  %s1596_s12 = sphi %s1653_s12, %s1829_s12   ;;  %s1592_s11 = sphi %s1651_s11, %s1828_s11   ;;  %s1588_s10 = sphi %s1649_s10, %s1827_s10   ;;  %s1584_s1 = sphi %s1647_s1, %s1826_s1  }
  0x1d   : > { %s1672_s15 = sadd.s32 1, %s1596_s12   ;;  %s100_s16 = sadd.s32 1, %s1592_s11 }
  0x1e   : > { %s97_s17 = ssub.s32 %s1596_s12, %s1672_s15  ;;  %p110_p10 = scmp.ne.s32.totalorder %s1592_s11, %s1588_s10 }
  0x1f   : > { %p98_p11 = scmp.eq.s32.totalorder %s97_s17, 0  ;;  %p111_p12 = scmp.eq.s32.totalorder %s1668_s13, 1 }
  0x20   : > { %p116_p13 = scmp.ne.s32.totalorder %s1588_s10, %s1584_s1  ;;  %p117_p0 = scmp.eq.s32.totalorder %s1407_s14, 1 }
  0x21   : > { %s1683_s18 = scalar_select %p98_p11, %s1592_s11, %s100_s16  }
  0x22   : > { %p1685_p1 = por %p111_p12, %p110_p10  ;;  %p1689_p2 = por %p117_p0, %p116_p13 }
  0x23   : > { %p1409_p3 = scmp.ge.s32.totalorder %s1596_s12, 1  ;;  %p144_p4 = scmp.lt.s32.totalorder %s1596_s12, 3 }
  0x25   : > { %p145_p5 = pnand %p1409_p3, %p144_p4 }
  0x26   : > { %s1820_s21 = sand.u32 (!%p145_p5), 1, %s1588_s10   ;;  %s1697_s22 = sshll.u32 (!%p145_p5), %s1668_s13, 3 }
  0x27   : > { %148 = sbr.rel (%p145_p5) target bundleno = 362 (0x16a), region = 32  ;;  %s1701_s23 = sshll.u32 (!%p145_p5), %s1820_s21, 3 }
  0x28   : > { %s164_s24 = sld [smem:[#allocation6 + %s1697_s22]] (!%p145_p5) }
  0x29   : > { %s165_s25 = sld [smem:[#allocation7 + %s1697_s22]] (!%p145_p5) }
  0x2e   : > { %s166_s28 = scalar_lea.vmem %s1813_s2, %s164_s24 }
  0x2f   : > { %v185_v0 = vld [vmem:[%s166_s28] sm:$0x1] }
  0x30   : > { %186 = vst [vmem:[#allocation2] sm:$0x1] %v185_v0 }
  0x31   : > { %212 = vsyncadd [#allocation4], 16  ;;  %s213_s9 = scalar_lea.vmem %s1814_s3, %s165_s25 }
  0x32   : > { %v233_v1 = vld [vmem:[%s213_s9] sm:$0x1] }
  0x33   : > { %234 = vst [vmem:[#allocation3] sm:$0x1] %v233_v1 }
  0x34   : > { %260 = vsyncadd [#allocation4 + $0x8], 16  ;;  %s261_s0 = sadd.s32 1, %s1697_s22 }
  0x35   : > { %s262_s14 = sld [smem:[#allocation6 + %s261_s0]] }
  0x36   : > { %s263_s16 = sld [smem:[#allocation7 + %s261_s0]] }
  0x3b   : > { %s264_s26 = scalar_lea.vmem %s1813_s2, %s262_s14 }
  0x3c   : > { %v285_v2 = vld [vmem:[%s264_s26] sm:$0x1] }
  0x3d   : > { %286 = vst [vmem:[#allocation2 + $0x1] sm:$0x1] %v285_v2 }
  0x3e   : > { %312 = vsyncadd [#allocation4 + $0x1], 16  ;;  %s313_s28 = scalar_lea.vmem %s1814_s3, %s263_s16 }
  0x3f   : > { %v334_v3 = vld [vmem:[%s313_s28] sm:$0x1] }
  0x40   : > { %335 = vst [vmem:[#allocation3 + $0x1] sm:$0x1] %v334_v3 }
  0x41   : > { %361 = vsyncadd [#allocation4 + $0x9], 16  ;;  %s362_s25 = sadd.s32 2, %s1697_s22 }
  0x42   : > { %s363_s30 = sld [smem:[#allocation6 + %s362_s25]] }
  0x43   : > { %s364_s8 = sld [smem:[#allocation7 + %s362_s25]] }
  0x48   : > { %s365_s29 = scalar_lea.vmem %s1813_s2, %s363_s30 }
  0x49   : > { %v386_v4 = vld [vmem:[%s365_s29] sm:$0x1] }
  0x4a   : > { %387 = vst [vmem:[#allocation2 + $0x2] sm:$0x1] %v386_v4 }
  0x4b   : > { %413 = vsyncadd [#allocation4 + $0x2], 16  ;;  %s414_s17 = scalar_lea.vmem %s1814_s3, %s364_s8 }
  0x4c   : > { %v435_v5 = vld [vmem:[%s414_s17] sm:$0x1] }
  0x4d   : > { %436 = vst [vmem:[#allocation3 + $0x2] sm:$0x1] %v435_v5 }
  0x4e   : > { %462 = vsyncadd [#allocation4 + $0xa], 16  ;;  %s463_s16 = sadd.s32 3, %s1697_s22 }
  0x4f   : > { %s464_s26 = sld [smem:[#allocation6 + %s463_s16]] }
  0x50   : > { %s465_s24 = sld [smem:[#allocation7 + %s463_s16]] }
  0x55   : > { %s466_s25 = scalar_lea.vmem %s1813_s2, %s464_s26 }
  0x56   : > { %v487_v6 = vld [vmem:[%s466_s25] sm:$0x1] }
  0x57   : > { %488 = vst [vmem:[#allocation2 + $0x3] sm:$0x1] %v487_v6 }
  0x58   : > { %514 = vsyncadd [#allocation4 + $0x3], 16  ;;  %s515_s9 = scalar_lea.vmem %s1814_s3, %s465_s24 }
  0x59   : > { %v536_v7 = vld [vmem:[%s515_s9] sm:$0x1] }
  0x5a   : > { %537 = vst [vmem:[#allocation3 + $0x3] sm:$0x1] %v536_v7 }
  0x5b   : > { %563 = vsyncadd [#allocation4 + $0xb], 16  ;;  %s564_s8 = sadd.s32 4, %s1697_s22 }
  0x5c   : > { %s565_s0 = sld [smem:[#allocation6 + %s564_s8]] }
  0x5d   : > { %s566_s21 = sld [smem:[#allocation7 + %s564_s8]] }
  0x62   : > { %s567_s16 = scalar_lea.vmem %s1813_s2, %s565_s0 }
  0x63   : > { %v588_v8 = vld [vmem:[%s567_s16] sm:$0x1] }
  0x64   : > { %589 = vst [vmem:[#allocation2 + $0x4] sm:$0x1] %v588_v8 }
  0x65   : > { %615 = vsyncadd [#allocation4 + $0x4], 16  ;;  %s616_s28 = scalar_lea.vmem %s1814_s3, %s566_s21 }
  0x66   : > { %v637_v9 = vld [vmem:[%s616_s28] sm:$0x1] }
  0x67   : > { %638 = vst [vmem:[#allocation3 + $0x4] sm:$0x1] %v637_v9 }
  0x68   : > { %664 = vsyncadd [#allocation4 + $0xc], 16  ;;  %s665_s24 = sadd.s32 5, %s1697_s22 }
  0x69   : > { %s666_s25 = sld [smem:[#allocation6 + %s665_s24]] }
  0x6a   : > { %s667_s29 = sld [smem:[#allocation7 + %s665_s24]] }
  0x6f   : > { %s668_s8 = scalar_lea.vmem %s1813_s2, %s666_s25 }
  0x70   : > { %v689_v10 = vld [vmem:[%s668_s8] sm:$0x1] }
  0x71   : > { %690 = vst [vmem:[#allocation2 + $0x5] sm:$0x1] %v689_v10 }
  0x72   : > { %716 = vsyncadd [#allocation4 + $0x5], 16  ;;  %s717_s17 = scalar_lea.vmem %s1814_s3, %s667_s29 }
  0x73   : > { %v738_v11 = vld [vmem:[%s717_s17] sm:$0x1] }
  0x74   : > { %739 = vst [vmem:[#allocation3 + $0x5] sm:$0x1] %v738_v11 }
  0x75   : > { %765 = vsyncadd [#allocation4 + $0xd], 16  ;;  %s766_s21 = sadd.s32 6, %s1697_s22 }
  0x76   : > { %s767_s16 = sld [smem:[#allocation6 + %s766_s21]] }
  0x77   : > { %s768_s26 = sld [smem:[#allocation7 + %s766_s21]] }
  0x7c   : > { %s769_s24 = scalar_lea.vmem %s1813_s2, %s767_s16 }
  0x7d   : > { %v790_v12 = vld [vmem:[%s769_s24] sm:$0x1] }
  0x7e   : > { %791 = vst [vmem:[#allocation2 + $0x6] sm:$0x1] %v790_v12 }
  0x7f   : > { %817 = vsyncadd [#allocation4 + $0x6], 16  ;;  %s818_s9 = scalar_lea.vmem %s1814_s3, %s768_s26 }
  0x80   : > { %v839_v13 = vld [vmem:[%s818_s9] sm:$0x1] }
  0x81   : > { %840 = vst [vmem:[#allocation3 + $0x6] sm:$0x1] %v839_v13 }
  0x82   : > { %866 = vsyncadd [#allocation4 + $0xe], 16  ;;  %s867_s29 = sadd.s32 7, %s1697_s22 }
  0x83   : > { %s868_s8 = sld [smem:[#allocation6 + %s867_s29]] }
  0x84   : > { %s869_s0 = sld [smem:[#allocation7 + %s867_s29]] }
  0x89   : > { %s870_s21 = scalar_lea.vmem %s1813_s2, %s868_s8 }
  0x8a   : > { %v891_v14 = vld [vmem:[%s870_s21] sm:$0x1] }
  0x8b   : > { %892 = vst [vmem:[#allocation2 + $0x7] sm:$0x1] %v891_v14 }
  0x8c   : > { %918 = vsyncadd [#allocation4 + $0x7], 16  ;;  %s919_s28 = scalar_lea.vmem %s1814_s3, %s869_s0 }
  0x8d   : > { %v940_v15 = vld [vmem:[%s919_s28] sm:$0x1] }
  0x8e   : > { %941 = vst [vmem:[#allocation3 + $0x7] sm:$0x1] %v940_v15 }
  0x8f   : > { %967 = vsyncadd [#allocation4 + $0xf], 16 }
  0x90   : > { %1546 = dma.done.wait [#allocation4], 16 }
  0x91   : > { %1547 = vsyncadd [#allocation4], 4294967280 }
  0x92   : > { %1548 = dma.done.wait [#allocation4 + $0x8], 16 }
  0x93   : > { %1549 = vsyncadd [#allocation4 + $0x8], 4294967280 }
  0x94   : > { %1550 = dma.done.wait [#allocation4 + $0x1], 16 }
  0x95   : > { %1551 = vsyncadd [#allocation4 + $0x1], 4294967280 }
  0x96   : > { %1552 = dma.done.wait [#allocation4 + $0x9], 16 }
  0x97   : > { %1553 = vsyncadd [#allocation4 + $0x9], 4294967280 }
  0x98   : > { %1554 = dma.done.wait [#allocation4 + $0x2], 16 }
  0x99   : > { %1555 = vsyncadd [#allocation4 + $0x2], 4294967280 }
  0x9a   : > { %1556 = dma.done.wait [#allocation4 + $0xa], 16 }
  0x9b   : > { %1557 = vsyncadd [#allocation4 + $0xa], 4294967280 }
  0x9c   : > { %1558 = dma.done.wait [#allocation4 + $0x3], 16 }
  0x9d   : > { %1559 = vsyncadd [#allocation4 + $0x3], 4294967280 }
  0x9e   : > { %1560 = dma.done.wait [#allocation4 + $0xb], 16 }
  0x9f   : > { %1561 = vsyncadd [#allocation4 + $0xb], 4294967280 }
  0xa0   : > { %1562 = dma.done.wait [#allocation4 + $0x4], 16 }
  0xa1   : > { %1563 = vsyncadd [#allocation4 + $0x4], 4294967280 }
  0xa2   : > { %1564 = dma.done.wait [#allocation4 + $0xc], 16 }
  0xa3   : > { %1565 = vsyncadd [#allocation4 + $0xc], 4294967280 }
  0xa4   : > { %1566 = dma.done.wait [#allocation4 + $0x5], 16 }
  0xa5   : > { %1567 = vsyncadd [#allocation4 + $0x5], 4294967280 }
  0xa6   : > { %1568 = dma.done.wait [#allocation4 + $0xd], 16 }
  0xa7   : > { %1569 = vsyncadd [#allocation4 + $0xd], 4294967280 }
  0xa8   : > { %1570 = dma.done.wait [#allocation4 + $0x6], 16 }
  0xa9   : > { %1571 = vsyncadd [#allocation4 + $0x6], 4294967280 }
  0xaa   : > { %1572 = dma.done.wait [#allocation4 + $0xe], 16 }
  0xab   : > { %1573 = vsyncadd [#allocation4 + $0xe], 4294967280 }
  0xac   : > { %1574 = dma.done.wait [#allocation4 + $0x7], 16 }
  0xad   : > { %1575 = vsyncadd [#allocation4 + $0x7], 4294967280 }
  0xae   : > { %1576 = dma.done.wait [#allocation4 + $0xf], 16 }
  0xaf   : > { %1577 = vsyncadd [#allocation4 + $0xf], 4294967280  ;;  %v1001_v16 = vld [vmem:[#allocation2] sm:$0xff]  ;;  %v1002_v17 = vld [vmem:[#allocation3] sm:$0xff]  ;;  %vm1012_vm0 = vcmask 261120   ;;  %s1416_s29 = sshll.u32 %s1668_s13, 7 }
  0xb0   : > { %v1412_v18 = vld [vmem:[%s1815_s4] ss:$0 sm:$0xff]  ;;  %v1003_v19 = vadd.f32 %v1002_v17, %v1001_v16  ;;  %s1823_s8 = scalar_lea.vmem [#allocation8], %s1701_s23  ;;  %s1057_s21 = scalar_lea.hbm %s1818_s7, %s1416_s29 }
  0xb1   : > { %v1413_v33 = vld [vmem:[%s1816_s5] ss:$0 sm:$0xff]  ;;  %s1059_s0 = sshll.u32 %s1823_s8, 4  ;;  %s1824_s16 = smov %s1823_s8  ;;  %s1060_s0 = int_to_ptr.vmem [resolvable:$true] %s1059_s0 }
  0xb2   : > { %v1011_v20 = vadd.f32 %v1412_v18, %v1003_v19  ;;  %v1414_v35 = vld [vmem:[%s1817_s6] ss:$0 sm:$0xff]  ;;  %s1825_s27 = sand.u32 1, %s1588_s10   ;;  %s1502_s22 = scalar_lea.vmem %s1060_s0, 128 }
  0xb3   : > { %s1046_s28 = scalar_lea.sflag [#allocation9], %s1825_s27  ;;  %p1503_p6 = scmp.ne.s32.totalorder %s1060_s0, %s1502_s22 }
  0xb4   : > { %v1013_v21 = vsel %vm1012_vm0, %v1011_v20, 0.0  ;;  %v1016_v22 = vmul.f32 %v1011_v20, %v1011_v20  ;;  %s1600_s13 = smov [#allocation8]  }
  0xb5   : > { %1014 = vadd.xlane.f32.xlu0 %v1013_v21  ;;  %p1504_p7 = pnand %p1503_p6, %p1685_p1  ;;  %s1506_s26 = sshll.u32 %s1600_s13, 4  ;;  %s1507_s26 = int_to_ptr.vmem [resolvable:$false] %s1506_s26 }
  0xb6   : > { %v1017_v23 = vsel %vm1012_vm0, %v1016_v22, 0.0  ;;  %s1508_s24 = scalar_lea.vmem %s1507_s26, 256  ;;  %p1509_p9 = scmp.lt.s32.totalorder %s1060_s0, %s1507_s26 }
  0xb7   : > { %p1505_p8 = pneg %p1504_p7  ;;  %p1510_p10 = scmp.lt.s32.totalorder %s1508_s24, %s1502_s22 }
  0xb9   : > { %1018 = vadd.xlane.f32.xlu0 %v1017_v23  ;;  %p1511_p11 = por %p1510_p10, %p1509_p9 }
  0xbb   : > { %p1512_p12 = pnand %p1511_p11, %p1505_p8 }
 0x13e   : > { %v1015_v24 = vpop.xlane.xlu0 %1014 }
 0x13f   : > { %v1020_v25 = vmul.f32 0.03125, %v1015_v24 }
 0x141   : > { %v1022_v27 = vmul.f32 %v1020_v25, %v1020_v25  ;;  %v1026_v31 = vsub.f32 %v1011_v20, %v1020_v25 }
 0x142   : > { %v1019_v26 = vpop.xlane.xlu0 %1018 }
 0x143   : > { %v1021_v28 = vmul.f32 0.03125, %v1019_v26 }
 0x145   : > { %v1023_v29 = vsub.f32 %v1021_v28, %v1022_v27 }
 0x147   : > { %v1024_v30 = vadd.f32 1e-05, %v1023_v29 }
 0x149   : > { %1476 = vrsqrt.f32 %v1024_v30 }
 0x156   : > { %v1477_v32 = vpop.eup %1476 }
 0x157   : > { %v1027_v34 = vmul.f32 %v1477_v32, %v1026_v31 }
 0x159   : > { %v1035_v36 = vmul.f32 %v1413_v33, %v1027_v34 }
 0x15b   : > { %v1043_v37 = vadd.f32 %v1414_v35, %v1035_v36 }
 0x15d   : > { %1044 = vst.msk [vmem:[%s1824_s16] sm:$0xff] %vm1012_vm0, %v1043_v37 }
 0x15e   : > { %1515 = shalt.err (!%p1512_p12)
}
 0x15f   : > { %s1516_s25 = scalar_lea.hbm %s1057_s21, 128  ;;  %s1520_s9 = scalar_lea.hbm %s1818_s7, 256 }
 0x160   : > { %p1517_p13 = scmp.ne.s32.totalorder %s1057_s21, %s1516_s25  ;;  %p1521_p4 = scmp.lt.s32.totalorder %s1057_s21, %s1818_s7 }
 0x161   : > { %p1522_p5 = scmp.lt.s32.totalorder %s1520_s9, %s1516_s25 }
 0x162   : > { %p1518_p0 = pnand %p1517_p13, %p1685_p1 }
 0x163   : > { %p1523_p6 = por %p1522_p5, %p1521_p4 }
 0x164   : > { %p1519_p3 = pneg %p1518_p0 }
 0x166   : > { %p1524_p7 = pnand %p1523_p6, %p1519_p3 }
 0x168   : > { %1527 = shalt.err (!%p1524_p7)
}
 0x169   : > { %1435 = dma.vmem_to_hbm [thread:$0]  (%p1685_p1), %s1060_s0, 128, %s1057_s21, %s1046_s28  }
 0x16a PF: > { %p1441_p8 = scmp.ge.s32.totalorder %s1596_s12, 2  ;;  %s1071_s14 = sand.u32 1, %s1584_s1  }
 0x16b   : > { %s1072_s17 = scalar_lea.sflag [#allocation9], %s1071_s14 }
 0x16c   : > { %p1438_p9 = pnand %p1441_p8, %p1689_p2 }
 0x16e   : > { %p1439_p10 = pneg %p1438_p9 }
 0x170   : > { %1579 = dma.done.wait (%p1439_p10), %s1072_s17, 128  }
 0x171   : > { %1581 = vsyncadd (%p1439_p10), %s1072_s17, 4294967168  ;;  %p27_p11 = scmp.ge.s32.totalorder %s1672_s15, 4   ;;  %s1826_s1 = smov %s1588_s10 }
 0x172   : > { %s1827_s10 = smov %s1592_s11  ;;  %s1828_s11 = smov %s1683_s18 }
 0x173   : > { %s1829_s12 = smov %s1672_s15  ;;  %29 = sbr.rel (!%p27_p11) target bundleno = 28 (0x1c), region = 764 }
 0x178   :  { %1077 = vsyncpa [#allocation9], 1 }
 0x179   :  { %1079 = vsyncpa [#allocation9 + $0x1], 1 }
 0x17a   :  { %1080 = vsyncmov [#allocation4] }
 0x17d   :  { %s1081_s12 = vpop.sfrf %1080 }
 0x17e   :  { %p1419_p1 = scmp.ne.s32.totalorder %s1081_s12, 0 }
 0x180   :  { %1085 = shalt.err (%p1419_p1)  }
 0x181   :  { %1087 = vsyncmov [#allocation4 + $0x1] }
 0x184   :  { %s1088_s19 = vpop.sfrf %1087 }
 0x185   :  { %p1420_p2 = scmp.ne.s32.totalorder %s1088_s19, 0 }
 0x187   :  { %1092 = shalt.err (%p1420_p2)  }
 0x188   :  { %1094 = vsyncmov [#allocation4 + $0x2] }
 0x18b   :  { %s1095_s20 = vpop.sfrf %1094 }
 0x18c   :  { %p1421_p12 = scmp.ne.s32.totalorder %s1095_s20, 0 }
 0x18e   :  { %1099 = shalt.err (%p1421_p12)  }
 0x18f   :  { %1101 = vsyncmov [#allocation4 + $0x3] }
 0x192   :  { %s1102_s0 = vpop.sfrf %1101 }
 0x193   :  { %p1422_p13 = scmp.ne.s32.totalorder %s1102_s0, 0 }
 0x195   :  { %1106 = shalt.err (%p1422_p13)  }
 0x196   :  { %1108 = vsyncmov [#allocation4 + $0x4] }
 0x199   :  { %s1109_s15 = vpop.sfrf %1108 }
 0x19a   :  { %p1423_p0 = scmp.ne.s32.totalorder %s1109_s15, 0 }
 0x19c   :  { %1113 = shalt.err (%p1423_p0)  }
 0x19d   :  { %1115 = vsyncmov [#allocation4 + $0x5] }
 0x1a0   :  { %s1116_s2 = vpop.sfrf %1115 }
 0x1a1   :  { %p1424_p3 = scmp.ne.s32.totalorder %s1116_s2, 0 }
 0x1a3   :  { %1120 = shalt.err (%p1424_p3)  }
 0x1a4   :  { %1122 = vsyncmov [#allocation4 + $0x6] }
 0x1a7   :  { %s1123_s3 = vpop.sfrf %1122 }
 0x1a8   :  { %p1425_p4 = scmp.ne.s32.totalorder %s1123_s3, 0 }
 0x1aa   :  { %1127 = shalt.err (%p1425_p4)  }
 0x1ab   :  { %1129 = vsyncmov [#allocation4 + $0x7] }
 0x1ae   :  { %s1130_s4 = vpop.sfrf %1129 }
 0x1af   :  { %p1426_p5 = scmp.ne.s32.totalorder %s1130_s4, 0 }
 0x1b1   :  { %1134 = shalt.err (%p1426_p5)  }
 0x1b2   :  { %1136 = vsyncmov [#allocation4 + $0x8] }
 0x1b5   :  { %s1137_s5 = vpop.sfrf %1136 }
 0x1b6   :  { %p1427_p6 = scmp.ne.s32.totalorder %s1137_s5, 0 }
 0x1b8   :  { %1141 = shalt.err (%p1427_p6)  }
 0x1b9   :  { %1143 = vsyncmov [#allocation4 + $0x9] }
 0x1bc   :  { %s1144_s6 = vpop.sfrf %1143 }
 0x1bd   :  { %p1428_p7 = scmp.ne.s32.totalorder %s1144_s6, 0 }
 0x1bf   :  { %1148 = shalt.err (%p1428_p7)  }
 0x1c0   :  { %1150 = vsyncmov [#allocation4 + $0xa] }
 0x1c3   :  { %s1151_s7 = vpop.sfrf %1150 }
 0x1c4   :  { %p1429_p8 = scmp.ne.s32.totalorder %s1151_s7, 0 }
 0x1c6   :  { %1155 = shalt.err (%p1429_p8)  }
 0x1c7   :  { %1157 = vsyncmov [#allocation4 + $0xb] }
 0x1ca   :  { %s1158_s1 = vpop.sfrf %1157 }
 0x1cb   :  { %p1430_p9 = scmp.ne.s32.totalorder %s1158_s1, 0 }
 0x1cd   :  { %1162 = shalt.err (%p1430_p9)  }
 0x1ce   :  { %1164 = vsyncmov [#allocation4 + $0xc] }
 0x1d1   :  { %s1165_s10 = vpop.sfrf %1164 }
 0x1d2   :  { %p1431_p10 = scmp.ne.s32.totalorder %s1165_s10, 0 }
 0x1d4   :  { %1169 = shalt.err (%p1431_p10)  }
 0x1d5   :  { %1171 = vsyncmov [#allocation4 + $0xd] }
 0x1d8   :  { %s1172_s11 = vpop.sfrf %1171 }
 0x1d9   :  { %p1432_p11 = scmp.ne.s32.totalorder %s1172_s11, 0 }
 0x1db   :  { %1176 = shalt.err (%p1432_p11)  }
 0x1dc   :  { %1178 = vsyncmov [#allocation4 + $0xe] }
 0x1df   :  { %s1179_s18 = vpop.sfrf %1178 }
 0x1e0   :  { %p1433_p1 = scmp.ne.s32.totalorder %s1179_s18, 0 }
 0x1e2   :  { %1183 = shalt.err (%p1433_p1)  }
 0x1e3   :  { %1185 = vsyncmov [#allocation4 + $0xf] }
 0x1e6   :  { %s1186_s21 = vpop.sfrf %1185 }
 0x1e7   :  { %p1434_p2 = scmp.ne.s32.totalorder %s1186_s21, 0 }
 0x1e9   :  { %1190 = shalt.err (%p1434_p2)  }

</bundles_post_ra>
